<compile_context>
chip_gen: v7x
topology: tpu7x:2x2x1
jax: 0.10.0
libtpu: 0.0.40
codegen_flags: <defaults>
</compile_context>

<pallas_src>
import functools

import jax
import jax.numpy as jnp
from jax.experimental import pallas as pl
from jax.experimental.pallas import tpu as pltpu

BN_EPS = 1e-5
NOUT = 128      # lane-dense padded output width (col 0 = q1, col 1 = q2)
K_TILE = 2048   # trunk reduction tile (multiple of 128); shared by pack + forward
LANE = 128


def _round_up(n, m):
    return ((n + m - 1) // m) * m


def critic_kernel(obs_ref, act_ref, wt_ref, affine_ref,
                  w1h_ref, w1a_ref, b1_ref, w2_ref, b2_ref, w3_ref, b3_ref,
                  out_ref, h_acc, *, repr_dim, k_tile):
    k = pl.program_id(0)

    @pl.when(k == 0)
    def _init():
        h_acc[...] = jnp.zeros_like(h_acc)

    # ---- trunk Linear: accumulate over the repr_dim (K) grid axis, f32 acc ----
    x = obs_ref[...]
    rem = repr_dim % k_tile            # static
    if rem:
        # Last K tile of obs is ragged: the OOB tail holds undefined data, so
        # mask it to zero (the padded wt rows are genuine zeros from pack time).
        col = jax.lax.broadcasted_iota(jnp.int32, x.shape, 1) + k * k_tile
        x = jnp.where(col < repr_dim, x, jnp.zeros_like(x))
    h_acc[...] += jnp.dot(x, wt_ref[...], preferred_element_type=jnp.float32)

    @pl.when(k == pl.num_programs(0) - 1)
    def _finalize():
        bt = affine_ref[0:1, :]
        gamma = affine_ref[1:2, :]
        beta = affine_ref[2:3, :]

        # ---- BatchNorm1d, training mode: one-pass batch stats (biased var) ----
        # TODO(synk): PyTorch BatchNorm1d also updates running_mean/running_var
        # in training mode; that parameter side effect is not reproduced here.
        h = h_acc[...] + bt
        mean = jnp.mean(h, axis=0, keepdims=True)
        ex2 = jnp.mean(h * h, axis=0, keepdims=True)
        var = jnp.maximum(ex2 - mean * mean, 0.0)
        h = (h - mean) * jax.lax.rsqrt(var + BN_EPS) * gamma + beta
        h = jnp.tanh(h)

        hid = w2_ref.shape[-1]
        act = act_ref[...]
        hb = h.astype(jnp.bfloat16)

        # ---- fused layer 1 of BOTH Q heads (split matmul instead of concat) ----
        z = (jnp.dot(hb, w1h_ref[...], preferred_element_type=jnp.float32)
             + jnp.dot(act, w1a_ref[...], preferred_element_type=jnp.float32)
             + b1_ref[...])
        z = jnp.maximum(z, 0.0)

        # ---- layer 2: separate per head (block-diag fusion would 2x FLOPs) ----
        z1 = z[:, :hid].astype(jnp.bfloat16)
        z2 = z[:, hid:].astype(jnp.bfloat16)
        y1 = jnp.maximum(
            jnp.dot(z1, w2_ref[0], preferred_element_type=jnp.float32)
            + b2_ref[0:1, :], 0.0).astype(jnp.bfloat16)
        y2 = jnp.maximum(
            jnp.dot(z2, w2_ref[1], preferred_element_type=jnp.float32)
            + b2_ref[1:2, :], 0.0).astype(jnp.bfloat16)

        # ---- fused, lane-dense layer 3 as a split-K matmul (no lane concat):
        # w3[0] carries q1's weights in column 0, w3[1] carries q2's in col 1.
        out_ref[...] = (jnp.dot(y1, w3_ref[0], preferred_element_type=jnp.float32)
                        + jnp.dot(y2, w3_ref[1], preferred_element_type=jnp.float32)
                        + b3_ref[...])


def _pick_vmem_limit(B, tk, F_pad, H, A):
    """Size the scoped VMEM limit from the actual footprint + headroom."""
    bf16, f32 = 2, 4
    streamed = 2 * (B * tk + tk * F_pad) * bf16            # obs + wt, double-buffered
    weights = (B * A * bf16 + 3 * F_pad * f32
               + F_pad * 2 * H * bf16 + A * 2 * H * bf16 + 2 * H * f32
               + 2 * H * H * bf16 + 2 * H * f32
               + 2 * H * NOUT * bf16 + NOUT * f32)          # single-buffered weights
    scratch = B * F_pad * f32                               # h_acc accumulator
    outbuf = 2 * B * NOUT * f32
    finalize_tmp = (4 * B * 2 * H + 2 * B * F_pad) * f32    # rough finalize temporaries
    need = streamed + weights + scratch + outbuf + finalize_tmp
    try:
        physical = pltpu.get_tpu_info().vmem_capacity_bytes
    except Exception:
        physical = 64 * 1024 * 1024                         # conservative (v7x per-TC)
    cap = physical - 12 * 1024 * 1024                       # leave compiler headroom
    return int(max(min(need + 8 * 1024 * 1024, cap), min(32 * 1024 * 1024, cap)))


def critic_forward(obs, action, packed, *, k_tile=K_TILE):
    B, repr_dim = obs.shape
    A = action.shape[1]
    F_pad = packed["affine"].shape[1]
    H = packed["w2"].shape[-1]

    # K tiling: single step when repr_dim fits; otherwise fixed k_tile (the
    # trunk weight was padded to a multiple of k_tile ONCE at pack time).
    tk = repr_dim if repr_dim <= k_tile else k_tile
    nk = pl.cdiv(repr_dim, tk)
    rp = nk * tk
    assert packed["wt"].shape[0] == rp, (
        "pack_params must be called with the same k_tile as critic_forward")

    # bf16 MXU operands (halves the dominant obs/wt DMA bytes); f32 accumulation.
    obs_b = obs.astype(jnp.bfloat16)
    act_b = action.astype(jnp.bfloat16)

    inputs = (obs_b, act_b, packed["wt"], packed["affine"],
              packed["w1h"], packed["w1a"], packed["b1"],
              packed["w2"], packed["b2"], packed["w3"], packed["b3"])

    flops = (2 * B * rp * F_pad + 2 * B * (F_pad + A) * 2 * H
             + 2 * 2 * B * H * H + 2 * 2 * B * H * NOUT)
    bytes_accessed = (sum(int(x.size) * x.dtype.itemsize for x in inputs)
                      + B * NOUT * 4)
    cost = pl.CostEstimate(flops=flops, transcendentals=B * F_pad,
                           bytes_accessed=bytes_accessed)

    vmem_limit = _pick_vmem_limit(B, tk, F_pad, H, A)
    kernel = functools.partial(critic_kernel, repr_dim=repr_dim, k_tile=tk)

    def build(single_buffer):
        def inv(shape, imap):
            # grid-invariant operand: double buffering buys nothing, so request
            # a single VMEM buffer (big VMEM saving at production H).
            if single_buffer:
                return pl.BlockSpec(shape, imap, pipeline_mode=pl.Buffered(1))
            return pl.BlockSpec(shape, imap)

        grid_spec = pltpu.PrefetchScalarGridSpec(
            num_scalar_prefetch=0,
            grid=(nk,),
            in_specs=[
                pl.BlockSpec((B, tk), lambda k: (0, k)),      # obs: streamed over K
                inv((B, A), lambda k: (0, 0)),                # action (resident)
                pl.BlockSpec((tk, F_pad), lambda k: (k, 0)),  # trunk W: streamed over K
                inv((3, F_pad), lambda k: (0, 0)),            # [bt; gamma; beta]
                inv((F_pad, 2 * H), lambda k: (0, 0)),        # fused W1 (h part)
                inv((A, 2 * H), lambda k: (0, 0)),            # fused W1 (action part)
                inv((1, 2 * H), lambda k: (0, 0)),            # fused b1
                inv((2, H, H), lambda k: (0, 0, 0)),          # stacked W2 (q1, q2)
                inv((2, H), lambda k: (0, 0)),                # stacked b2
                inv((2, H, NOUT), lambda k: (0, 0, 0)),       # stacked, padded W3
                inv((1, NOUT), lambda k: (0, 0)),             # fused, padded b3
            ],
            out_specs=pl.BlockSpec((B, NOUT), lambda k: (0, 0)),
            scratch_shapes=[pltpu.VMEM((B, F_pad), jnp.float32)],  # trunk accumulator
        )
        return pl.pallas_call(
            kernel,
            out_shape=jax.ShapeDtypeStruct((B, NOUT), jnp.float32),
            grid_spec=grid_spec,
            compiler_params=pltpu.CompilerParams(
                dimension_semantics=("arbitrary",),
                vmem_limit_bytes=vmem_limit),
            cost_estimate=cost,
        )

    try:
        out = build(single_buffer=True)(*inputs)
    except Exception:
        # pipeline_mode=pl.Buffered not supported by this JAX build's main
        # pallas_call pipeline -> fall back to default double buffering.
        out = build(single_buffer=False)(*inputs)

    # TODO(synk): on v7x the two TensorCores could be exploited by splitting the
    # K reduction (per-core partial h_acc + shared combine) or by running one Q
    # head per core after the trunk; not done here to keep BN batch-stats simple.
    return out[:, 0:1], out[:, 1:2]


def make_params(key, repr_dim, action_dim, feature_dim, hidden_dim):
    ks = jax.random.split(key, 7)

    def lin(k, fan_in, fan_out):
        # deterministic orthogonal-ish init stand-in: scaled normal, zero bias
        w = 0.1 * jax.random.normal(k, (fan_in, fan_out), jnp.float32)
        b = jnp.zeros((1, fan_out), jnp.float32)
        return w, b

    wt, bt = lin(ks[0], repr_dim, feature_dim)
    gamma = jnp.ones((1, feature_dim), jnp.float32)   # BN affine defaults
    beta = jnp.zeros((1, feature_dim), jnp.float32)

    def q_params(k0, k1, k2):
        w1, b1 = lin(k0, feature_dim + action_dim, hidden_dim)
        w2, b2 = lin(k1, hidden_dim, hidden_dim)
        w3, b3 = lin(k2, hidden_dim, 1)
        # split W1 rows into the h-part and the action-part (concat-free matmul)
        return dict(w1h=w1[:feature_dim], w1a=w1[feature_dim:], b1=b1,
                    w2=w2, b2=b2, w3=w3, b3=b3)

    q1 = q_params(ks[1], ks[2], ks[3])
    q2 = q_params(ks[4], ks[5], ks[6])

    params = dict(wt=wt, bt=bt, gamma=gamma, beta=beta)
    for name, q in (("q1", q1), ("q2", q2)):
        for k, v in q.items():
            params[f"{name}_{k}"] = v
    return params


def pack_params(p, *, k_tile=K_TILE):
    """One-time packing: fuse/consolidate operands, lane-pad feature_dim to a
    multiple of 128, pad trunk-weight rows to the K tile, cast matmul weights
    to bf16.  All padding happens here (parameters), never per forward call."""
    repr_dim, F = p["wt"].shape
    H = p["q1_w2"].shape[0]
    F_pad = _round_up(F, LANE)

    tk = repr_dim if repr_dim <= k_tile else k_tile
    rp = pl.cdiv(repr_dim, tk) * tk

    wt = jnp.pad(p["wt"], ((0, rp - repr_dim), (0, F_pad - F)))

    affine = jnp.concatenate([p["bt"], p["gamma"], p["beta"]], axis=0)   # (3, F)
    affine = jnp.pad(affine, ((0, 0), (0, F_pad - F)))                   # padded cols: 0

    w1h = jnp.concatenate([p["q1_w1h"], p["q2_w1h"]], axis=1)            # (F, 2H)
    w1h = jnp.pad(w1h, ((0, F_pad - F), (0, 0)))                         # zero rows

    w3 = jnp.zeros((2, H, NOUT), jnp.float32)
    w3 = w3.at[0, :, 0].set(p["q1_w3"][:, 0])
    w3 = w3.at[1, :, 1].set(p["q2_w3"][:, 0])
    b3 = jnp.zeros((1, NOUT), jnp.float32)
    b3 = b3.at[0, 0].set(p["q1_b3"][0, 0]).at[0, 1].set(p["q2_b3"][0, 0])

    return dict(
        wt=wt.astype(jnp.bfloat16),
        affine=affine,                                                   # (3,F_pad) f32
        w1h=w1h.astype(jnp.bfloat16),
        w1a=jnp.concatenate([p["q1_w1a"], p["q2_w1a"]], axis=1).astype(jnp.bfloat16),
        b1=jnp.concatenate([p["q1_b1"], p["q2_b1"]], axis=1),            # (1,2H) f32
        w2=jnp.stack([p["q1_w2"], p["q2_w2"]], axis=0).astype(jnp.bfloat16),
        b2=jnp.concatenate([p["q1_b2"], p["q2_b2"]], axis=0),            # (2,H) f32
        w3=w3.astype(jnp.bfloat16),
        b3=b3,                                                           # (1,NOUT) f32
    )


def reference_forward(obs, action, p):
    h = obs @ p["wt"] + p["bt"]
    mean = h.mean(axis=0, keepdims=True)
    var = ((h - mean) ** 2).mean(axis=0, keepdims=True)
    h = (h - mean) / jnp.sqrt(var + BN_EPS) * p["gamma"] + p["beta"]
    h = jnp.tanh(h)

    def q(prefix):
        x = h @ p[f"{prefix}_w1h"] + action @ p[f"{prefix}_w1a"] + p[f"{prefix}_b1"]
        x = jnp.maximum(x, 0.0)
        x = jnp.maximum(x @ p[f"{prefix}_w2"] + p[f"{prefix}_b2"], 0.0)
        return x @ p[f"{prefix}_w3"] + p[f"{prefix}_b3"]

    return q("q1"), q("q2")


if __name__ == "__main__":
    B, repr_dim, action_dim, feature_dim, hidden_dim = 8, 64, 4, 32, 32

    key = jax.random.PRNGKey(0)
    k_obs, k_act, k_par = jax.random.split(key, 3)
    obs = jax.random.normal(k_obs, (B, repr_dim), jnp.float32)      # already flat
    action = jax.random.normal(k_act, (B, action_dim), jnp.float32)
    params = make_params(k_par, repr_dim, action_dim, feature_dim, hidden_dim)
    packed = pack_params(params)

    q1, q2 = critic_forward(obs, action, packed)
    jax.block_until_ready((q1, q2))

    r1, r2 = reference_forward(obs, action, params)
    assert q1.shape == (B, 1) and q2.shape == (B, 1)
    # bf16 MXU operands with f32 accumulation -> loosened tolerance vs f32 ref
    assert jnp.allclose(q1, r1, atol=2e-2, rtol=2e-2)
    assert jnp.allclose(q2, r2, atol=2e-2, rtol=2e-2)

    print("KERNEL_OK")
</pallas_src>

<mosaic_0001>
module attributes {stable_mosaic.version = 11 : i64} {
  func.func @critic_kernel(%arg0: i32, %arg1: memref<8x64xbf16, #tpu.memory_space<vmem>>, %arg2: memref<8x4xbf16, #tpu.memory_space<vmem>>, %arg3: memref<64x128xbf16, #tpu.memory_space<vmem>>, %arg4: memref<3x128xf32, #tpu.memory_space<vmem>>, %arg5: memref<128x64xbf16, #tpu.memory_space<vmem>>, %arg6: memref<4x64xbf16, #tpu.memory_space<vmem>>, %arg7: memref<1x64xf32, #tpu.memory_space<vmem>>, %arg8: memref<2x32x32xbf16, #tpu.memory_space<vmem>>, %arg9: memref<2x32xf32, #tpu.memory_space<vmem>>, %arg10: memref<2x32x128xbf16, #tpu.memory_space<vmem>>, %arg11: memref<1x128xf32, #tpu.memory_space<vmem>>, %arg12: memref<8x128xf32, #tpu.memory_space<vmem>>, %arg13: memref<8x128xf32, #tpu.memory_space<vmem>>) attributes {dimension_semantics = [#tpu.dimension_semantics<arbitrary>], iteration_bounds = array<i64: 1>, scalar_prefetch = 0 : i64, scratch_operands = 1 : i64, tpu.core_type = #tpu.core_type<tc>, window_params = [{transform_indices = @transform_0, window_bounds = array<i64: 8, 64>}, {pipeline_mode = #tpu.pipeline_mode<synchronous>, transform_indices = @transform_1, window_bounds = array<i64: 8, 4>}, {transform_indices = @transform_2, window_bounds = array<i64: 64, 128>}, {pipeline_mode = #tpu.pipeline_mode<synchronous>, transform_indices = @transform_3, window_bounds = array<i64: 3, 128>}, {pipeline_mode = #tpu.pipeline_mode<synchronous>, transform_indices = @transform_4, window_bounds = array<i64: 128, 64>}, {pipeline_mode = #tpu.pipeline_mode<synchronous>, transform_indices = @transform_5, window_bounds = array<i64: 4, 64>}, {pipeline_mode = #tpu.pipeline_mode<synchronous>, transform_indices = @transform_6, window_bounds = array<i64: 1, 64>}, {pipeline_mode = #tpu.pipeline_mode<synchronous>, transform_indices = @transform_7, window_bounds = array<i64: 2, 32, 32>}, {pipeline_mode = #tpu.pipeline_mode<synchronous>, transform_indices = @transform_8, window_bounds = array<i64: 2, 32>}, {pipeline_mode = #tpu.pipeline_mode<synchronous>, transform_indices = @transform_9, window_bounds = array<i64: 2, 32, 128>}, {pipeline_mode = #tpu.pipeline_mode<synchronous>, transform_indices = @transform_10, window_bounds = array<i64: 1, 128>}, {pipeline_mode = #tpu.pipeline_mode<synchronous>, transform_indices = @transform_11, window_bounds = array<i64: 8, 128>}]} {
    %c0_i32 = arith.constant 0 : i32
    %0 = arith.cmpi eq, %arg0, %c0_i32 : i32
    %1 = arith.extui %0 : i1 to i32
    %c0_i32_0 = arith.constant 0 : i32
    %2 = arith.cmpi ne, %1, %c0_i32_0 : i32
    scf.if %2 {
      %cst_10 = arith.constant 0.000000e+00 : f32
      %12 = vector.broadcast %cst_10 : f32 to vector<8x128xf32>
      %c0_11 = arith.constant 0 : index
      %c0_12 = arith.constant 0 : index
      %13 = vector.load %arg13[%c0_11, %c0_12] : memref<8x128xf32, #tpu.memory_space<vmem>>, vector<8x128xf32>
      tpu.vector_store %arg13[%c0_11, %c0_12], %12 {strides = array<i32>} : memref<8x128xf32, #tpu.memory_space<vmem>>, vector<8x128xf32>,
    } else {
    }
    %c0 = arith.constant 0 : index
    %c0_1 = arith.constant 0 : index
    %3 = vector.load %arg1[%c0, %c0_1] : memref<8x64xbf16, #tpu.memory_space<vmem>>, vector<8x64xbf16>
    %c0_2 = arith.constant 0 : index
    %c0_3 = arith.constant 0 : index
    %4 = vector.load %arg13[%c0_2, %c0_3] : memref<8x128xf32, #tpu.memory_space<vmem>>, vector<8x128xf32>
    %c0_4 = arith.constant 0 : index
    %c0_5 = arith.constant 0 : index
    %5 = vector.load %arg3[%c0_4, %c0_5] : memref<64x128xbf16, #tpu.memory_space<vmem>>, vector<64x128xbf16>
    %cst = arith.constant dense<0.000000e+00> : vector<8x128xf32>
    %6 = tpu.matmul %3, %5, %cst {dimension_numbers = #tpu.dot_dimension_numbers<[1], [0], [0], [1], [0, 0, 1, 1], [], []>} : vector<8x64xbf16>, vector<64x128xbf16>, vector<8x128xf32> -> vector<8x128xf32>
    %7 = arith.addf %4, %6 : vector<8x128xf32>
    %c0_6 = arith.constant 0 : index
    %c0_7 = arith.constant 0 : index
    %8 = vector.load %arg13[%c0_6, %c0_7] : memref<8x128xf32, #tpu.memory_space<vmem>>, vector<8x128xf32>
    tpu.vector_store %arg13[%c0_6, %c0_7], %7 {strides = array<i32>} : memref<8x128xf32, #tpu.memory_space<vmem>>, vector<8x128xf32>,
    %c0_i32_8 = arith.constant 0 : i32
    %9 = arith.cmpi eq, %arg0, %c0_i32_8 : i32
    %10 = arith.extui %9 : i1 to i32
    %c0_i32_9 = arith.constant 0 : i32
    %11 = arith.cmpi ne, %10, %c0_i32_9 : i32
    scf.if %11 {
      %c0_10 = arith.constant 0 : index
      %c0_11 = arith.constant 0 : index
      %12 = vector.load %arg4[%c0_10, %c0_11] : memref<3x128xf32, #tpu.memory_space<vmem>>, vector<1x128xf32>
      %c1 = arith.constant 1 : index
      %c0_12 = arith.constant 0 : index
      %13 = vector.load %arg4[%c1, %c0_12] : memref<3x128xf32, #tpu.memory_space<vmem>>, vector<1x128xf32>
      %c2 = arith.constant 2 : index
      %c0_13 = arith.constant 0 : index
      %14 = vector.load %arg4[%c2, %c0_13] : memref<3x128xf32, #tpu.memory_space<vmem>>, vector<1x128xf32>
      %c0_14 = arith.constant 0 : index
      %c0_15 = arith.constant 0 : index
      %15 = vector.load %arg13[%c0_14, %c0_15] : memref<8x128xf32, #tpu.memory_space<vmem>>, vector<8x128xf32>
      %16 = vector.broadcast %12 : vector<1x128xf32> to vector<8x128xf32>
      %17 = arith.addf %15, %16 : vector<8x128xf32>
      %cst_16 = arith.constant dense<0.000000e+00> : vector<128xf32>
      %18 = vector.multi_reduction <add>, %17, %cst_16 [0] : vector<8x128xf32> to vector<128xf32>
      %19 = vector.shape_cast %18 : vector<128xf32> to vector<1x128xf32>
      %cst_17 = arith.constant 8.000000e+00 : f32
      %20 = vector.broadcast %cst_17 : f32 to vector<1x128xf32>
      %21 = arith.divf %19, %20 : vector<1x128xf32>
      %22 = arith.mulf %17, %17 : vector<8x128xf32>
      %cst_18 = arith.constant dense<0.000000e+00> : vector<128xf32>
      %23 = vector.multi_reduction <add>, %22, %cst_18 [0] : vector<8x128xf32> to vector<128xf32>
      %24 = vector.shape_cast %23 : vector<128xf32> to vector<1x128xf32>
      %cst_19 = arith.constant 8.000000e+00 : f32
      %25 = vector.broadcast %cst_19 : f32 to vector<1x128xf32>
      %26 = arith.divf %24, %25 : vector<1x128xf32>
      %27 = arith.mulf %21, %21 : vector<1x128xf32>
      %28 = arith.subf %26, %27 : vector<1x128xf32>
      %cst_20 = arith.constant 0.000000e+00 : f32
      %29 = vector.broadcast %cst_20 : f32 to vector<1x128xf32>
      %30 = arith.maximumf %28, %29 : vector<1x128xf32>
      %31 = vector.broadcast %21 : vector<1x128xf32> to vector<8x128xf32>
      %32 = arith.subf %17, %31 : vector<8x128xf32>
      %cst_21 = arith.constant 9.99999974E-6 : f32
      %33 = vector.broadcast %cst_21 : f32 to vector<1x128xf32>
      %34 = arith.addf %30, %33 : vector<1x128xf32>
      %35 = math.rsqrt %34 : vector<1x128xf32>
      %36 = vector.broadcast %35 : vector<1x128xf32> to vector<8x128xf32>
      %37 = arith.mulf %32, %36 : vector<8x128xf32>
      %38 = vector.broadcast %13 : vector<1x128xf32> to vector<8x128xf32>
      %39 = arith.mulf %37, %38 : vector<8x128xf32>
      %40 = vector.broadcast %14 : vector<1x128xf32> to vector<8x128xf32>
      %41 = arith.addf %39, %40 : vector<8x128xf32>
      %42 = math.tanh %41 : vector<8x128xf32>
      %c0_22 = arith.constant 0 : index
      %c0_23 = arith.constant 0 : index
      %43 = vector.load %arg2[%c0_22, %c0_23] : memref<8x4xbf16, #tpu.memory_space<vmem>>, vector<8x4xbf16>
      %44 = arith.truncf %42 : vector<8x128xf32> to vector<8x128xbf16>
      %c0_24 = arith.constant 0 : index
      %c0_25 = arith.constant 0 : index
      %45 = vector.load %arg5[%c0_24, %c0_25] : memref<128x64xbf16, #tpu.memory_space<vmem>>, vector<128x64xbf16>
      %cst_26 = arith.constant dense<0.000000e+00> : vector<8x64xf32>
      %46 = tpu.matmul %44, %45, %cst_26 {dimension_numbers = #tpu.dot_dimension_numbers<[1], [0], [0], [1], [0, 0, 1, 1], [], []>} : vector<8x128xbf16>, vector<128x64xbf16>, vector<8x64xf32> -> vector<8x64xf32>
      %c0_27 = arith.constant 0 : index
      %c0_28 = arith.constant 0 : index
      %47 = vector.load %arg6[%c0_27, %c0_28] : memref<4x64xbf16, #tpu.memory_space<vmem>>, vector<4x64xbf16>
      %cst_29 = arith.constant dense<0.000000e+00> : vector<8x64xf32>
      %48 = tpu.matmul %43, %47, %cst_29 {dimension_numbers = #tpu.dot_dimension_numbers<[1], [0], [0], [1], [0, 0, 1, 1], [], []>} : vector<8x4xbf16>, vector<4x64xbf16>, vector<8x64xf32> -> vector<8x64xf32>
      %49 = arith.addf %46, %48 : vector<8x64xf32>
      %c0_30 = arith.constant 0 : index
      %c0_31 = arith.constant 0 : index
      %50 = vector.load %arg7[%c0_30, %c0_31] : memref<1x64xf32, #tpu.memory_space<vmem>>, vector<1x64xf32>
      %51 = vector.broadcast %50 : vector<1x64xf32> to vector<8x64xf32>
      %52 = arith.addf %49, %51 : vector<8x64xf32>
      %cst_32 = arith.constant 0.000000e+00 : f32
      %53 = vector.broadcast %cst_32 : f32 to vector<8x64xf32>
      %54 = arith.maximumf %52, %53 : vector<8x64xf32>
      %55 = vector.extract_strided_slice %54 {offsets = [0, 0], sizes = [8, 32], strides = [1, 1]} : vector<8x64xf32> to vector<8x32xf32>
      %56 = arith.truncf %55 : vector<8x32xf32> to vector<8x32xbf16>
      %57 = vector.extract_strided_slice %54 {offsets = [0, 32], sizes = [8, 32], strides = [1, 1]} : vector<8x64xf32> to vector<8x32xf32>
      %58 = arith.truncf %57 : vector<8x32xf32> to vector<8x32xbf16>
      %c0_33 = arith.constant 0 : index
      %c0_34 = arith.constant 0 : index
      %c0_35 = arith.constant 0 : index
      %59 = vector.load %arg8[%c0_33, %c0_34, %c0_35] : memref<2x32x32xbf16, #tpu.memory_space<vmem>>, vector<1x32x32xbf16>
      %60 = vector.shape_cast %59 : vector<1x32x32xbf16> to vector<32x32xbf16>
      %cst_36 = arith.constant dense<0.000000e+00> : vector<8x32xf32>
      %61 = tpu.matmul %56, %60, %cst_36 {dimension_numbers = #tpu.dot_dimension_numbers<[1], [0], [0], [1], [0, 0, 1, 1], [], []>} : vector<8x32xbf16>, vector<32x32xbf16>, vector<8x32xf32> -> vector<8x32xf32>
      %c0_37 = arith.constant 0 : index
      %c0_38 = arith.constant 0 : index
      %62 = vector.load %arg9[%c0_37, %c0_38] : memref<2x32xf32, #tpu.memory_space<vmem>>, vector<1x32xf32>
      %63 = vector.broadcast %62 : vector<1x32xf32> to vector<8x32xf32>
      %64 = arith.addf %61, %63 : vector<8x32xf32>
      %cst_39 = arith.constant 0.000000e+00 : f32
      %65 = vector.broadcast %cst_39 : f32 to vector<8x32xf32>
      %66 = arith.maximumf %64, %65 : vector<8x32xf32>
      %67 = arith.truncf %66 : vector<8x32xf32> to vector<8x32xbf16>
      %c1_40 = arith.constant 1 : index
      %c0_41 = arith.constant 0 : index
      %c0_42 = arith.constant 0 : index
      %68 = vector.load %arg8[%c1_40, %c0_41, %c0_42] : memref<2x32x32xbf16, #tpu.memory_space<vmem>>, vector<1x32x32xbf16>
      %69 = vector.shape_cast %68 : vector<1x32x32xbf16> to vector<32x32xbf16>
      %cst_43 = arith.constant dense<0.000000e+00> : vector<8x32xf32>
      %70 = tpu.matmul %58, %69, %cst_43 {dimension_numbers = #tpu.dot_dimension_numbers<[1], [0], [0], [1], [0, 0, 1, 1], [], []>} : vector<8x32xbf16>, vector<32x32xbf16>, vector<8x32xf32> -> vector<8x32xf32>
      %c1_44 = arith.constant 1 : index
      %c0_45 = arith.constant 0 : index
      %71 = vector.load %arg9[%c1_44, %c0_45] : memref<2x32xf32, #tpu.memory_space<vmem>>, vector<1x32xf32>
      %72 = vector.broadcast %71 : vector<1x32xf32> to vector<8x32xf32>
      %73 = arith.addf %70, %72 : vector<8x32xf32>
      %cst_46 = arith.constant 0.000000e+00 : f32
      %74 = vector.broadcast %cst_46 : f32 to vector<8x32xf32>
      %75 = arith.maximumf %73, %74 : vector<8x32xf32>
      %76 = arith.truncf %75 : vector<8x32xf32> to vector<8x32xbf16>
      %c0_47 = arith.constant 0 : index
      %c0_48 = arith.constant 0 : index
      %c0_49 = arith.constant 0 : index
      %77 = vector.load %arg10[%c0_47, %c0_48, %c0_49] : memref<2x32x128xbf16, #tpu.memory_space<vmem>>, vector<1x32x128xbf16>
      %78 = vector.shape_cast %77 : vector<1x32x128xbf16> to vector<32x128xbf16>
      %cst_50 = arith.constant dense<0.000000e+00> : vector<8x128xf32>
      %79 = tpu.matmul %67, %78, %cst_50 {dimension_numbers = #tpu.dot_dimension_numbers<[1], [0], [0], [1], [0, 0, 1, 1], [], []>} : vector<8x32xbf16>, vector<32x128xbf16>, vector<8x128xf32> -> vector<8x128xf32>
      %c1_51 = arith.constant 1 : index
      %c0_52 = arith.constant 0 : index
      %c0_53 = arith.constant 0 : index
      %80 = vector.load %arg10[%c1_51, %c0_52, %c0_53] : memref<2x32x128xbf16, #tpu.memory_space<vmem>>, vector<1x32x128xbf16>
      %81 = vector.shape_cast %80 : vector<1x32x128xbf16> to vector<32x128xbf16>
      %cst_54 = arith.constant dense<0.000000e+00> : vector<8x128xf32>
      %82 = tpu.matmul %76, %81, %cst_54 {dimension_numbers = #tpu.dot_dimension_numbers<[1], [0], [0], [1], [0, 0, 1, 1], [], []>} : vector<8x32xbf16>, vector<32x128xbf16>, vector<8x128xf32> -> vector<8x128xf32>
      %83 = arith.addf %79, %82 : vector<8x128xf32>
      %c0_55 = arith.constant 0 : index
      %c0_56 = arith.constant 0 : index
      %84 = vector.load %arg11[%c0_55, %c0_56] : memref<1x128xf32, #tpu.memory_space<vmem>>, vector<1x128xf32>
      %85 = vector.broadcast %84 : vector<1x128xf32> to vector<8x128xf32>
      %86 = arith.addf %83, %85 : vector<8x128xf32>
      %c0_57 = arith.constant 0 : index
      %c0_58 = arith.constant 0 : index
      %87 = vector.load %arg12[%c0_57, %c0_58] : memref<8x128xf32, #tpu.memory_space<vmem>>, vector<8x128xf32>
      tpu.vector_store %arg12[%c0_57, %c0_58], %86 {strides = array<i32>} : memref<8x128xf32, #tpu.memory_space<vmem>>, vector<8x128xf32>,
    } else {
    }
    return
  }
  func.func @transform_0(%arg0: i32) -> (i32, i32) {
    %c0_i32 = arith.constant 0 : i32
    %c0_i32_0 = arith.constant 0 : i32
    return %c0_i32, %arg0 : i32, i32
  }
  func.func @transform_1(%arg0: i32) -> (i32, i32) {
    %c0_i32 = arith.constant 0 : i32
    %c0_i32_0 = arith.constant 0 : i32
    %c0_i32_1 = arith.constant 0 : i32
    return %c0_i32, %c0_i32_0 : i32, i32
  }
  func.func @transform_2(%arg0: i32) -> (i32, i32) {
    %c0_i32 = arith.constant 0 : i32
    %c0_i32_0 = arith.constant 0 : i32
    return %arg0, %c0_i32 : i32, i32
  }
  func.func @transform_3(%arg0: i32) -> (i32, i32) {
    %c0_i32 = arith.constant 0 : i32
    %c0_i32_0 = arith.constant 0 : i32
    %c0_i32_1 = arith.constant 0 : i32
    return %c0_i32, %c0_i32_0 : i32, i32
  }
  func.func @transform_4(%arg0: i32) -> (i32, i32) {
    %c0_i32 = arith.constant 0 : i32
    %c0_i32_0 = arith.constant 0 : i32
    %c0_i32_1 = arith.constant 0 : i32
    return %c0_i32, %c0_i32_0 : i32, i32
  }
  func.func @transform_5(%arg0: i32) -> (i32, i32) {
    %c0_i32 = arith.constant 0 : i32
    %c0_i32_0 = arith.constant 0 : i32
    %c0_i32_1 = arith.constant 0 : i32
    return %c0_i32, %c0_i32_0 : i32, i32
  }
  func.func @transform_6(%arg0: i32) -> (i32, i32) {
    %c0_i32 = arith.constant 0 : i32
    %c0_i32_0 = arith.constant 0 : i32
    %c0_i32_1 = arith.constant 0 : i32
    return %c0_i32, %c0_i32_0 : i32, i32
  }
  func.func @transform_7(%arg0: i32) -> (i32, i32, i32) {
    %c0_i32 = arith.constant 0 : i32
    %c0_i32_0 = arith.constant 0 : i32
    %c0_i32_1 = arith.constant 0 : i32
    %c0_i32_2 = arith.constant 0 : i32
    return %c0_i32, %c0_i32_0, %c0_i32_1 : i32, i32, i32
  }
  func.func @transform_8(%arg0: i32) -> (i32, i32) {
    %c0_i32 = arith.constant 0 : i32
    %c0_i32_0 = arith.constant 0 : i32
    %c0_i32_1 = arith.constant 0 : i32
    return %c0_i32, %c0_i32_0 : i32, i32
  }
  func.func @transform_9(%arg0: i32) -> (i32, i32, i32) {
    %c0_i32 = arith.constant 0 : i32
    %c0_i32_0 = arith.constant 0 : i32
    %c0_i32_1 = arith.constant 0 : i32
    %c0_i32_2 = arith.constant 0 : i32
    return %c0_i32, %c0_i32_0, %c0_i32_1 : i32, i32, i32
  }
  func.func @transform_10(%arg0: i32) -> (i32, i32) {
    %c0_i32 = arith.constant 0 : i32
    %c0_i32_0 = arith.constant 0 : i32
    %c0_i32_1 = arith.constant 0 : i32
    return %c0_i32, %c0_i32_0 : i32, i32
  }
  func.func @transform_11(%arg0: i32) -> (i32, i32) {
    %c0_i32 = arith.constant 0 : i32
    %c0_i32_0 = arith.constant 0 : i32
    %c0_i32_1 = arith.constant 0 : i32
    return %c0_i32, %c0_i32_0 : i32, i32
  }
}

module attributes {stable_mosaic.version = 11 : i64} {
  func.func @critic_kernel(%arg0: i32, %arg1: memref<8x64xbf16, #tpu.memory_space<vmem>>, %arg2: memref<8x4xbf16, #tpu.memory_space<vmem>>, %arg3: memref<64x128xbf16, #tpu.memory_space<vmem>>, %arg4: memref<3x128xf32, #tpu.memory_space<vmem>>, %arg5: memref<128x64xbf16, #tpu.memory_space<vmem>>, %arg6: memref<4x64xbf16, #tpu.memory_space<vmem>>, %arg7: memref<1x64xf32, #tpu.memory_space<vmem>>, %arg8: memref<2x32x32xbf16, #tpu.memory_space<vmem>>, %arg9: memref<2x32xf32, #tpu.memory_space<vmem>>, %arg10: memref<2x32x128xbf16, #tpu.memory_space<vmem>>, %arg11: memref<1x128xf32, #tpu.memory_space<vmem>>, %arg12: memref<8x128xf32, #tpu.memory_space<vmem>>, %arg13: memref<8x128xf32, #tpu.memory_space<vmem>>) attributes {dimension_semantics = [#tpu.dimension_semantics<arbitrary>], iteration_bounds = array<i64: 1>, scalar_prefetch = 0 : i64, scratch_operands = 1 : i64, tpu.core_type = #tpu.core_type<tc>, window_params = [{transform_indices = @transform_0, window_bounds = array<i64: 8, 64>}, {pipeline_mode = #tpu.pipeline_mode<synchronous>, transform_indices = @transform_1, window_bounds = array<i64: 8, 4>}, {transform_indices = @transform_2, window_bounds = array<i64: 64, 128>}, {pipeline_mode = #tpu.pipeline_mode<synchronous>, transform_indices = @transform_3, window_bounds = array<i64: 3, 128>}, {pipeline_mode = #tpu.pipeline_mode<synchronous>, transform_indices = @transform_4, window_bounds = array<i64: 128, 64>}, {pipeline_mode = #tpu.pipeline_mode<synchronous>, transform_indices = @transform_5, window_bounds = array<i64: 4, 64>}, {pipeline_mode = #tpu.pipeline_mode<synchronous>, transform_indices = @transform_6, window_bounds = array<i64: 1, 64>}, {pipeline_mode = #tpu.pipeline_mode<synchronous>, transform_indices = @transform_7, window_bounds = array<i64: 2, 32, 32>}, {pipeline_mode = #tpu.pipeline_mode<synchronous>, transform_indices = @transform_8, window_bounds = array<i64: 2, 32>}, {pipeline_mode = #tpu.pipeline_mode<synchronous>, transform_indices = @transform_9, window_bounds = array<i64: 2, 32, 128>}, {pipeline_mode = #tpu.pipeline_mode<synchronous>, transform_indices = @transform_10, window_bounds = array<i64: 1, 128>}, {pipeline_mode = #tpu.pipeline_mode<synchronous>, transform_indices = @transform_11, window_bounds = array<i64: 8, 128>}]} {
    %c0_i32 = arith.constant 0 : i32
    %0 = arith.cmpi eq, %arg0, %c0_i32 : i32
    %1 = arith.extui %0 : i1 to i32
    %c0_i32_0 = arith.constant 0 : i32
    %2 = arith.cmpi ne, %1, %c0_i32_0 : i32
    scf.if %2 {
      %cst_10 = arith.constant 0.000000e+00 : f32
      %12 = vector.broadcast %cst_10 : f32 to vector<8x128xf32>
      %c0_11 = arith.constant 0 : index
      %c0_12 = arith.constant 0 : index
      %13 = vector.load %arg13[%c0_11, %c0_12] : memref<8x128xf32, #tpu.memory_space<vmem>>, vector<8x128xf32>
      tpu.vector_store %arg13[%c0_11, %c0_12], %12 {strides = array<i32>} : memref<8x128xf32, #tpu.memory_space<vmem>>, vector<8x128xf32>,
    } else {
    }
    %c0 = arith.constant 0 : index
    %c0_1 = arith.constant 0 : index
    %3 = vector.load %arg1[%c0, %c0_1] : memref<8x64xbf16, #tpu.memory_space<vmem>>, vector<8x64xbf16>
    %c0_2 = arith.constant 0 : index
    %c0_3 = arith.constant 0 : index
    %4 = vector.load %arg13[%c0_2, %c0_3] : memref<8x128xf32, #tpu.memory_space<vmem>>, vector<8x128xf32>
    %c0_4 = arith.constant 0 : index
    %c0_5 = arith.constant 0 : index
    %5 = vector.load %arg3[%c0_4, %c0_5] : memref<64x128xbf16, #tpu.memory_space<vmem>>, vector<64x128xbf16>
    %cst = arith.constant dense<0.000000e+00> : vector<8x128xf32>
    %6 = tpu.matmul %3, %5, %cst {dimension_numbers = #tpu.dot_dimension_numbers<[1], [0], [0], [1], [0, 0, 1, 1], [], []>} : vector<8x64xbf16>, vector<64x128xbf16>, vector<8x128xf32> -> vector<8x128xf32>
    %7 = arith.addf %4, %6 : vector<8x128xf32>
    %c0_6 = arith.constant 0 : index
    %c0_7 = arith.constant 0 : index
    %8 = vector.load %arg13[%c0_6, %c0_7] : memref<8x128xf32, #tpu.memory_space<vmem>>, vector<8x128xf32>
    tpu.vector_store %arg13[%c0_6, %c0_7], %7 {strides = array<i32>} : memref<8x128xf32, #tpu.memory_space<vmem>>, vector<8x128xf32>,
    %c0_i32_8 = arith.constant 0 : i32
    %9 = arith.cmpi eq, %arg0, %c0_i32_8 : i32
    %10 = arith.extui %9 : i1 to i32
    %c0_i32_9 = arith.constant 0 : i32
    %11 = arith.cmpi ne, %10, %c0_i32_9 : i32
    scf.if %11 {
      %c0_10 = arith.constant 0 : index
      %c0_11 = arith.constant 0 : index
      %12 = vector.load %arg4[%c0_10, %c0_11] : memref<3x128xf32, #tpu.memory_space<vmem>>, vector<1x128xf32>
      %c1 = arith.constant 1 : index
      %c0_12 = arith.constant 0 : index
      %13 = vector.load %arg4[%c1, %c0_12] : memref<3x128xf32, #tpu.memory_space<vmem>>, vector<1x128xf32>
      %c2 = arith.constant 2 : index
      %c0_13 = arith.constant 0 : index
      %14 = vector.load %arg4[%c2, %c0_13] : memref<3x128xf32, #tpu.memory_space<vmem>>, vector<1x128xf32>
      %c0_14 = arith.constant 0 : index
      %c0_15 = arith.constant 0 : index
      %15 = vector.load %arg13[%c0_14, %c0_15] : memref<8x128xf32, #tpu.memory_space<vmem>>, vector<8x128xf32>
      %16 = vector.broadcast %12 : vector<1x128xf32> to vector<8x128xf32>
      %17 = arith.addf %15, %16 : vector<8x128xf32>
      %cst_16 = arith.constant dense<0.000000e+00> : vector<128xf32>
      %18 = vector.multi_reduction <add>, %17, %cst_16 [0] : vector<8x128xf32> to vector<128xf32>
      %19 = vector.shape_cast %18 : vector<128xf32> to vector<1x128xf32>
      %cst_17 = arith.constant 8.000000e+00 : f32
      %20 = vector.broadcast %cst_17 : f32 to vector<1x128xf32>
      %21 = arith.divf %19, %20 : vector<1x128xf32>
      %22 = arith.mulf %17, %17 : vector<8x128xf32>
      %cst_18 = arith.constant dense<0.000000e+00> : vector<128xf32>
      %23 = vector.multi_reduction <add>, %22, %cst_18 [0] : vector<8x128xf32> to vector<128xf32>
      %24 = vector.shape_cast %23 : vector<128xf32> to vector<1x128xf32>
      %cst_19 = arith.constant 8.000000e+00 : f32
      %25 = vector.broadcast %cst_19 : f32 to vector<1x128xf32>
      %26 = arith.divf %24, %25 : vector<1x128xf32>
      %27 = arith.mulf %21, %21 : vector<1x128xf32>
      %28 = arith.subf %26, %27 : vector<1x128xf32>
      %cst_20 = arith.constant 0.000000e+00 : f32
      %29 = vector.broadcast %cst_20 : f32 to vector<1x128xf32>
      %30 = arith.maximumf %28, %29 : vector<1x128xf32>
      %31 = vector.broadcast %21 : vector<1x128xf32> to vector<8x128xf32>
      %32 = arith.subf %17, %31 : vector<8x128xf32>
      %cst_21 = arith.constant 9.99999974E-6 : f32
      %33 = vector.broadcast %cst_21 : f32 to vector<1x128xf32>
      %34 = arith.addf %30, %33 : vector<1x128xf32>
      %35 = math.rsqrt %34 : vector<1x128xf32>
      %36 = vector.broadcast %35 : vector<1x128xf32> to vector<8x128xf32>
      %37 = arith.mulf %32, %36 : vector<8x128xf32>
      %38 = vector.broadcast %13 : vector<1x128xf32> to vector<8x128xf32>
      %39 = arith.mulf %37, %38 : vector<8x128xf32>
      %40 = vector.broadcast %14 : vector<1x128xf32> to vector<8x128xf32>
      %41 = arith.addf %39, %40 : vector<8x128xf32>
      %42 = math.tanh %41 : vector<8x128xf32>
      %c0_22 = arith.constant 0 : index
      %c0_23 = arith.constant 0 : index
      %43 = vector.load %arg2[%c0_22, %c0_23] : memref<8x4xbf16, #tpu.memory_space<vmem>>, vector<8x4xbf16>
      %44 = arith.truncf %42 : vector<8x128xf32> to vector<8x128xbf16>
      %c0_24 = arith.constant 0 : index
      %c0_25 = arith.constant 0 : index
      %45 = vector.load %arg5[%c0_24, %c0_25] : memref<128x64xbf16, #tpu.memory_space<vmem>>, vector<128x64xbf16>
      %cst_26 = arith.constant dense<0.000000e+00> : vector<8x64xf32>
      %46 = tpu.matmul %44, %45, %cst_26 {dimension_numbers = #tpu.dot_dimension_numbers<[1], [0], [0], [1], [0, 0, 1, 1], [], []>} : vector<8x128xbf16>, vector<128x64xbf16>, vector<8x64xf32> -> vector<8x64xf32>
      %c0_27 = arith.constant 0 : index
      %c0_28 = arith.constant 0 : index
      %47 = vector.load %arg6[%c0_27, %c0_28] : memref<4x64xbf16, #tpu.memory_space<vmem>>, vector<4x64xbf16>
      %cst_29 = arith.constant dense<0.000000e+00> : vector<8x64xf32>
      %48 = tpu.matmul %43, %47, %cst_29 {dimension_numbers = #tpu.dot_dimension_numbers<[1], [0], [0], [1], [0, 0, 1, 1], [], []>} : vector<8x4xbf16>, vector<4x64xbf16>, vector<8x64xf32> -> vector<8x64xf32>
      %49 = arith.addf %46, %48 : vector<8x64xf32>
      %c0_30 = arith.constant 0 : index
      %c0_31 = arith.constant 0 : index
      %50 = vector.load %arg7[%c0_30, %c0_31] : memref<1x64xf32, #tpu.memory_space<vmem>>, vector<1x64xf32>
      %51 = vector.broadcast %50 : vector<1x64xf32> to vector<8x64xf32>
      %52 = arith.addf %49, %51 : vector<8x64xf32>
      %cst_32 = arith.constant 0.000000e+00 : f32
      %53 = vector.broadcast %cst_32 : f32 to vector<8x64xf32>
      %54 = arith.maximumf %52, %53 : vector<8x64xf32>
      %55 = vector.extract_strided_slice %54 {offsets = [0, 0], sizes = [8, 32], strides = [1, 1]} : vector<8x64xf32> to vector<8x32xf32>
      %56 = arith.truncf %55 : vector<8x32xf32> to vector<8x32xbf16>
      %57 = vector.extract_strided_slice %54 {offsets = [0, 32], sizes = [8, 32], strides = [1, 1]} : vector<8x64xf32> to vector<8x32xf32>
      %58 = arith.truncf %57 : vector<8x32xf32> to vector<8x32xbf16>
      %c0_33 = arith.constant 0 : index
      %c0_34 = arith.constant 0 : index
      %c0_35 = arith.constant 0 : index
      %59 = vector.load %arg8[%c0_33, %c0_34, %c0_35] : memref<2x32x32xbf16, #tpu.memory_space<vmem>>, vector<1x32x32xbf16>
      %60 = vector.shape_cast %59 : vector<1x32x32xbf16> to vector<32x32xbf16>
      %cst_36 = arith.constant dense<0.000000e+00> : vector<8x32xf32>
      %61 = tpu.matmul %56, %60, %cst_36 {dimension_numbers = #tpu.dot_dimension_numbers<[1], [0], [0], [1], [0, 0, 1, 1], [], []>} : vector<8x32xbf16>, vector<32x32xbf16>, vector<8x32xf32> -> vector<8x32xf32>
      %c0_37 = arith.constant 0 : index
      %c0_38 = arith.constant 0 : index
      %62 = vector.load %arg9[%c0_37, %c0_38] : memref<2x32xf32, #tpu.memory_space<vmem>>, vector<1x32xf32>
      %63 = vector.broadcast %62 : vector<1x32xf32> to vector<8x32xf32>
      %64 = arith.addf %61, %63 : vector<8x32xf32>
      %cst_39 = arith.constant 0.000000e+00 : f32
      %65 = vector.broadcast %cst_39 : f32 to vector<8x32xf32>
      %66 = arith.maximumf %64, %65 : vector<8x32xf32>
      %67 = arith.truncf %66 : vector<8x32xf32> to vector<8x32xbf16>
      %c1_40 = arith.constant 1 : index
      %c0_41 = arith.constant 0 : index
      %c0_42 = arith.constant 0 : index
      %68 = vector.load %arg8[%c1_40, %c0_41, %c0_42] : memref<2x32x32xbf16, #tpu.memory_space<vmem>>, vector<1x32x32xbf16>
      %69 = vector.shape_cast %68 : vector<1x32x32xbf16> to vector<32x32xbf16>
      %cst_43 = arith.constant dense<0.000000e+00> : vector<8x32xf32>
      %70 = tpu.matmul %58, %69, %cst_43 {dimension_numbers = #tpu.dot_dimension_numbers<[1], [0], [0], [1], [0, 0, 1, 1], [], []>} : vector<8x32xbf16>, vector<32x32xbf16>, vector<8x32xf32> -> vector<8x32xf32>
      %c1_44 = arith.constant 1 : index
      %c0_45 = arith.constant 0 : index
      %71 = vector.load %arg9[%c1_44, %c0_45] : memref<2x32xf32, #tpu.memory_space<vmem>>, vector<1x32xf32>
      %72 = vector.broadcast %71 : vector<1x32xf32> to vector<8x32xf32>
      %73 = arith.addf %70, %72 : vector<8x32xf32>
      %cst_46 = arith.constant 0.000000e+00 : f32
      %74 = vector.broadcast %cst_46 : f32 to vector<8x32xf32>
      %75 = arith.maximumf %73, %74 : vector<8x32xf32>
      %76 = arith.truncf %75 : vector<8x32xf32> to vector<8x32xbf16>
      %c0_47 = arith.constant 0 : index
      %c0_48 = arith.constant 0 : index
      %c0_49 = arith.constant 0 : index
      %77 = vector.load %arg10[%c0_47, %c0_48, %c0_49] : memref<2x32x128xbf16, #tpu.memory_space<vmem>>, vector<1x32x128xbf16>
      %78 = vector.shape_cast %77 : vector<1x32x128xbf16> to vector<32x128xbf16>
      %cst_50 = arith.constant dense<0.000000e+00> : vector<8x128xf32>
      %79 = tpu.matmul %67, %78, %cst_50 {dimension_numbers = #tpu.dot_dimension_numbers<[1], [0], [0], [1], [0, 0, 1, 1], [], []>} : vector<8x32xbf16>, vector<32x128xbf16>, vector<8x128xf32> -> vector<8x128xf32>
      %c1_51 = arith.constant 1 : index
      %c0_52 = arith.constant 0 : index
      %c0_53 = arith.constant 0 : index
      %80 = vector.load %arg10[%c1_51, %c0_52, %c0_53] : memref<2x32x128xbf16, #tpu.memory_space<vmem>>, vector<1x32x128xbf16>
      %81 = vector.shape_cast %80 : vector<1x32x128xbf16> to vector<32x128xbf16>
      %cst_54 = arith.constant dense<0.000000e+00> : vector<8x128xf32>
      %82 = tpu.matmul %76, %81, %cst_54 {dimension_numbers = #tpu.dot_dimension_numbers<[1], [0], [0], [1], [0, 0, 1, 1], [], []>} : vector<8x32xbf16>, vector<32x128xbf16>, vector<8x128xf32> -> vector<8x128xf32>
      %83 = arith.addf %79, %82 : vector<8x128xf32>
      %c0_55 = arith.constant 0 : index
      %c0_56 = arith.constant 0 : index
      %84 = vector.load %arg11[%c0_55, %c0_56] : memref<1x128xf32, #tpu.memory_space<vmem>>, vector<1x128xf32>
      %85 = vector.broadcast %84 : vector<1x128xf32> to vector<8x128xf32>
      %86 = arith.addf %83, %85 : vector<8x128xf32>
      %c0_57 = arith.constant 0 : index
      %c0_58 = arith.constant 0 : index
      %87 = vector.load %arg12[%c0_57, %c0_58] : memref<8x128xf32, #tpu.memory_space<vmem>>, vector<8x128xf32>
      tpu.vector_store %arg12[%c0_57, %c0_58], %86 {strides = array<i32>} : memref<8x128xf32, #tpu.memory_space<vmem>>, vector<8x128xf32>,
    } else {
    }
    return
  }
  func.func @transform_0(%arg0: i32) -> (i32, i32) {
    %c0_i32 = arith.constant 0 : i32
    %c0_i32_0 = arith.constant 0 : i32
    return %c0_i32, %arg0 : i32, i32
  }
  func.func @transform_1(%arg0: i32) -> (i32, i32) {
    %c0_i32 = arith.constant 0 : i32
    %c0_i32_0 = arith.constant 0 : i32
    %c0_i32_1 = arith.constant 0 : i32
    return %c0_i32, %c0_i32_0 : i32, i32
  }
  func.func @transform_2(%arg0: i32) -> (i32, i32) {
    %c0_i32 = arith.constant 0 : i32
    %c0_i32_0 = arith.constant 0 : i32
    return %arg0, %c0_i32 : i32, i32
  }
  func.func @transform_3(%arg0: i32) -> (i32, i32) {
    %c0_i32 = arith.constant 0 : i32
    %c0_i32_0 = arith.constant 0 : i32
    %c0_i32_1 = arith.constant 0 : i32
    return %c0_i32, %c0_i32_0 : i32, i32
  }
  func.func @transform_4(%arg0: i32) -> (i32, i32) {
    %c0_i32 = arith.constant 0 : i32
    %c0_i32_0 = arith.constant 0 : i32
    %c0_i32_1 = arith.constant 0 : i32
    return %c0_i32, %c0_i32_0 : i32, i32
  }
  func.func @transform_5(%arg0: i32) -> (i32, i32) {
    %c0_i32 = arith.constant 0 : i32
    %c0_i32_0 = arith.constant 0 : i32
    %c0_i32_1 = arith.constant 0 : i32
    return %c0_i32, %c0_i32_0 : i32, i32
  }
  func.func @transform_6(%arg0: i32) -> (i32, i32) {
    %c0_i32 = arith.constant 0 : i32
    %c0_i32_0 = arith.constant 0 : i32
    %c0_i32_1 = arith.constant 0 : i32
    return %c0_i32, %c0_i32_0 : i32, i32
  }
  func.func @transform_7(%arg0: i32) -> (i32, i32, i32) {
    %c0_i32 = arith.constant 0 : i32
    %c0_i32_0 = arith.constant 0 : i32
    %c0_i32_1 = arith.constant 0 : i32
    %c0_i32_2 = arith.constant 0 : i32
    return %c0_i32, %c0_i32_0, %c0_i32_1 : i32, i32, i32
  }
  func.func @transform_8(%arg0: i32) -> (i32, i32) {
    %c0_i32 = arith.constant 0 : i32
    %c0_i32_0 = arith.constant 0 : i32
    %c0_i32_1 = arith.constant 0 : i32
    return %c0_i32, %c0_i32_0 : i32, i32
  }
  func.func @transform_9(%arg0: i32) -> (i32, i32, i32) {
    %c0_i32 = arith.constant 0 : i32
    %c0_i32_0 = arith.constant 0 : i32
    %c0_i32_1 = arith.constant 0 : i32
    %c0_i32_2 = arith.constant 0 : i32
    return %c0_i32, %c0_i32_0, %c0_i32_1 : i32, i32, i32
  }
  func.func @transform_10(%arg0: i32) -> (i32, i32) {
    %c0_i32 = arith.constant 0 : i32
    %c0_i32_0 = arith.constant 0 : i32
    %c0_i32_1 = arith.constant 0 : i32
    return %c0_i32, %c0_i32_0 : i32, i32
  }
  func.func @transform_11(%arg0: i32) -> (i32, i32) {
    %c0_i32 = arith.constant 0 : i32
    %c0_i32_0 = arith.constant 0 : i32
    %c0_i32_1 = arith.constant 0 : i32
    return %c0_i32, %c0_i32_0 : i32, i32
  }
}

</mosaic_0001>

<bundles_post_ra>
// kernel: tpu_custom_call.1
= control target key start
LH: loop header
LB: loop body
LE: loop exit
PB: predicated region body
PF: predicated region fallthrough
CT: control target
= control target key end

     0   :  { %v806_v1 = vmov 0.0   ;;  %vm807_vm0 = vmmov 0   ;;  %vm79_vm1 = vcmask 523264   ;;  %s1011_s0 = inlined_call_operand.vmem [shape: bf16[8,64], index: 0, kind: input, shape index: {}]   ;;  %s1012_s1 = inlined_call_operand.vmem [shape: bf16[8,4], index: 1, kind: input, shape index: {}]   ;;  %s1013_s2 = inlined_call_operand.vmem [shape: bf16[64,128], index: 2, kind: input, shape index: {}]   ;;  %s1014_s3 = inlined_call_operand.vmem [shape: f32[3,128], index: 3, kind: input, shape index: {}]   ;;  %s1015_s4 = inlined_call_operand.vmem [shape: bf16[128,64], index: 4, kind: input, shape index: {}]   ;;  %s1016_s5 = inlined_call_operand.vmem [shape: bf16[4,64], index: 5, kind: input, shape index: {}]   ;;  %s1017_s6 = inlined_call_operand.vmem [shape: f32[1,64], index: 6, kind: input, shape index: {}]   ;;  %s1018_s7 = inlined_call_operand.vmem [shape: bf16[2,32,32], index: 7, kind: input, shape index: {}]   ;;  %s1019_s8 = inlined_call_operand.vmem [shape: f32[2,32], index: 8, kind: input, shape index: {}]   ;;  %s1020_s9 = inlined_call_operand.vmem [shape: bf16[2,32,128], index: 9, kind: input, shape index: {}]   ;;  %s1021_s10 = inlined_call_operand.vmem [shape: f32[1,128], index: 10, kind: input, shape index: {}]   ;;  %s1022_s11 = inlined_call_operand.hbm [shape: f32[8,128], index: 11, kind: output, shape index: {}]  }
   0x1   :  { %v758_v0 = vld [vmem:[%s1013_s2] sm:$0xff]   ;;  %684 = vmatprep.subr.bf16.mxu0 %v806_v1  ;;  %696 = vmatprep.subr.bf16.mxu1 %v806_v1  ;;  %v759_v2 = vld [vmem:[%s1013_s2 + $0x8] sm:$0xff]   ;;  %v760_v3 = vld [vmem:[%s1013_s2 + $0x10] sm:$0xff]  }
   0x2   :  { %685 = vmatpush3.bf16.msra.mxu0 %v758_v0  ;;  %692 = vmatprep.mubr.msk.bf16.mxu0 %vm807_vm0, %v806_v1  ;;  %v761_v4 = vld [vmem:[%s1013_s2 + $0x18] sm:$0xff]   ;;  %v45_v5 = vld [vmem:[%s1011_s0] sm:$0xf] }
   0x3   :  { %686 = vmatprep.subr.bf16.mxu0 %v806_v1  ;;  %698 = vmatprep.mubr.msk.bf16.mxu1 %vm807_vm0, %v806_v1 }
   0x6   :  { %687 = vmatpush3.bf16.msra.mxu0 %v759_v2 }
   0x7   :  { %688 = vmatprep.subr.bf16.mxu0 %v806_v1 }
   0xa   :  { %689 = vmatpush3.bf16.msra.mxu0 %v760_v3 }
   0xb   :  { %690 = vmatprep.subr.bf16.mxu0 %v806_v1 }
   0xe   :  { %691 = vmatpush3.bf16.msra.mxu0 %v761_v4 }
   0xf   :  { %722 = vmatprep.subr.bf16.mxu0 %v806_v1 }
  0x10   :  { %16 = vsyncpa [#allocation4], 0  ;;  %v189_v6 = vld [vmem:[%s1016_s5] sm:$0x3]  ;;  %vm194_vm2 = vcmask 1041408   ;;  %vm190_vm3 = vcmask 31744  }
  0x11   :  { %693 = vmatmul.mubr.msk.bf16.vlgmr.msra.gmra.mrb[0].mxu0 %vm79_vm1, %v45_v5  ;;  %v196_v7 = vsel %vm194_vm2, %v189_v6, 0  ;;  %v171_v8 = vld [vmem:[%s1012_s1] sm:$0xf]  ;;  %v763_v10 = vld [vmem:[%s1015_s4 + $0x8] sm:$0xff]   ;;  %v764_v11 = vld [vmem:[%s1015_s4 + $0x10] sm:$0xff]   ;;  %vm357_vm4 = vcmask 261120  }
  0x12   :  { %726 = vmatprep.mubr.msk.bf16.mxu0 %vm807_vm0, %v806_v1  ;;  %697 = vmatpush3.bf16.msra.mxu1 %v196_v7  ;;  %v762_v9 = vld [vmem:[%s1015_s4] sm:$0xff]   ;;  %v765_v12 = vld [vmem:[%s1015_s4 + $0x18] sm:$0xff]   ;;  %v767_v14 = vld [vmem:[%s1015_s4 + $0x28] sm:$0xff]   ;;  %s808_s13 = smov 96   ;;  %s809_s26 = smov [#allocation3]  }
  0x13   :  { %702 = vmatprep.subr.bf16.mxu1 %v806_v1  ;;  %v766_v13 = vld [vmem:[%s1015_s4 + $0x20] sm:$0xff]   ;;  %v768_v15 = vld [vmem:[%s1015_s4 + $0x30] sm:$0xff]   ;;  %v769_v16 = vld [vmem:[%s1015_s4 + $0x38] sm:$0xff]  }
  0x14   :  { %v620_v17 = vld [vmem:[%s1014_s3] ss:$0 sm:$0xff]  ;;  %v621_v44 = vld [vmem:[%s1014_s3 + $0x1] ss:$0 sm:$0xff]  ;;  %v622_v46 = vld [vmem:[%s1014_s3 + $0x2] ss:$0 sm:$0xff] }
  0x15   :  { %699 = vmatmul.mubr.msk.bf16.vlgmr.msra.gmra.mrb[0].mxu1 %vm190_vm3, %v171_v8  ;;  %v770_v55 = vld [vmem:[%s1018_s7] sm:$0xff]   ;;  %v771_v56 = vld [vmem:[%s1018_s7 + $0x8] sm:$0xff]   ;;  %v772_v2 = vld [vmem:[%s1018_s7 + $0x10] sm:$0xff]  }
  0x16   :  { %718 = vmatprep.mubr.msk.bf16.mxu1 %vm807_vm0, %v806_v1  ;;  %703 = vmatpush3.bf16.msra.mxu1 %v762_v9  ;;  %v632_v58 = vld [vmem:[%s1017_s6] ss:$0 sm:$0xff]  ;;  %v773_v4 = vld [vmem:[%s1018_s7 + $0x18] sm:$0xff]   ;;  %v775_v6 = vld [vmem:[%s1020_s9 + $0x8] sm:$0xff]  }
  0x17   :  { %704 = vmatprep.subr.bf16.mxu1 %v806_v1  ;;  %723 = vmatpush3.bf16.msra.mxu0 %v770_v55  ;;  %v774_v5 = vld [vmem:[%s1020_s9] sm:$0xff]   ;;  %v776_v7 = vld [vmem:[%s1020_s9 + $0x10] sm:$0xff]   ;;  %v777_v9 = vld [vmem:[%s1020_s9 + $0x18] sm:$0xff]  }
  0x18   :  { %724 = vmatprep.subr.bf16.mxu0 %v806_v1 }
  0x1a   :  { %705 = vmatpush3.bf16.msra.mxu1 %v763_v10  ;;  %v633_v10 = vld [vmem:[%s1019_s8] ss:$0 sm:$0xff] }
  0x1b   :  { %706 = vmatprep.subr.bf16.mxu1 %v806_v1  ;;  %725 = vmatpush3.bf16.msra.mxu0 %v771_v56 }
  0x1c   :  { %730 = vmatprep.subr.bf16.mxu0 %v806_v1 }
  0x1e   :  { %707 = vmatpush3.bf16.msra.mxu1 %v764_v11 }
  0x1f   :  { %708 = vmatprep.subr.bf16.mxu1 %v806_v1 }
  0x22   :  { %709 = vmatpush3.bf16.msra.mxu1 %v765_v12 }
  0x23   :  { %710 = vmatprep.subr.bf16.mxu1 %v806_v1 }
  0x26   :  { %711 = vmatpush3.bf16.msra.mxu1 %v766_v13 }
  0x27   :  { %712 = vmatprep.subr.bf16.mxu1 %v806_v1 }
  0x2a   :  { %713 = vmatpush3.bf16.msra.mxu1 %v767_v14 }
  0x2b   :  { %714 = vmatprep.subr.bf16.mxu1 %v806_v1 }
  0x2e   :  { %715 = vmatpush3.bf16.msra.mxu1 %v768_v15 }
  0x2f   :  { %716 = vmatprep.subr.bf16.mxu1 %v806_v1 }
  0x32   :  { %717 = vmatpush3.bf16.msra.mxu1 %v769_v16 }
  0x33   :  { %746 = vmatprep.subr.bf16.mxu1 %v806_v1 }
  0xe4   :  { %v117_v18 = vpop.f32.mrb[0].mxu0 }
  0xe5   :  { %v136_v19 = vadd.f32 %v620_v17, %v117_v18  ;;  %v694_v20 = vpop.f32.mrb[1].mxu0 }
  0xe6   :  { %v120_v21 = vpop.f32.mrb[2].mxu0 }
  0xe7   :  { %v137_v22 = vrot.slane %v136_v19, 4  ;;  %v145_v23 = vmul.f32 %v136_v19, %v136_v19  ;;  %v695_v24 = vpop.f32.mrb[3].mxu0 }
  0xe8   :  { %v232_v51 = vpop.f32.mrb[0].mxu1 }
  0xe9   :  { %v138_v25 = vadd.f32 %v137_v22, %v136_v19  ;;  %v146_v26 = vrot.slane %v145_v23, 4  ;;  %v700_v52 = vpop.f32.mrb[1].mxu1 }
  0xea   :  { %v235_v53 = vpop.f32.mrb[2].mxu1 }
  0xeb   :  { %v139_v27 = vrot.slane %v138_v25, 2  ;;  %v147_v28 = vadd.f32 %v146_v26, %v145_v23  ;;  %v701_v54 = vpop.f32.mrb[3].mxu1 }
  0xed   :  { %v140_v29 = vadd.f32 %v139_v27, %v138_v25  ;;  %v148_v30 = vrot.slane %v147_v28, 2 }
  0xef   :  { %v141_v31 = vrot.slane %v140_v29, 1  ;;  %v149_v32 = vadd.f32 %v148_v30, %v147_v28  ;;  %v655_v30 = vld [vmem:[%s1021_s10] ss:$0 sm:$0xff] }
  0xf1   :  { %v142_v33 = vadd.f32 %v141_v31, %v140_v29  ;;  %v150_v34 = vrot.slane %v149_v32, 1 }
  0xf3   :  { %v144_v35 = vmul.f32 0.125, %v142_v33  ;;  %v151_v36 = vadd.f32 %v150_v34, %v149_v32 }
  0xf5   :  { %v152_v37 = vmul.f32 0.125, %v151_v36  ;;  %v153_v38 = vmul.f32 %v144_v35, %v144_v35  ;;  %v156_v42 = vsub.f32 %v136_v19, %v144_v35 }
  0xf7   :  { %v154_v39 = vsub.f32 %v152_v37, %v153_v38 }
  0xf9   :  { %v155_v40 = vmax.f32 %v154_v39, 0.0 }
  0xfb   :  { %v157_v41 = vadd.f32 1e-05, %v155_v40 }
  0xfd   :  { %778 = vrsqrt.f32 %v157_v41 }
 0x107   :  { %v779_v43 = vpop.eup %778 }
 0x108   :  { %v159_v45 = vmul.f32 %v779_v43, %v156_v42 }
 0x10a   :  { %v164_v47 = vmul.f32 %v621_v44, %v159_v45 }
 0x10c   :  { %v169_v48 = vadd.f32 %v622_v46, %v164_v47 }
 0x10e   :  { %780 = vtanh.f32 %v169_v48 }
 0x118   :  { %v781_v49 = vpop.eup %780 }
 0x119   :  { %v172_v50 = vpack.c.bf16 %v781_v49, %v781_v49 }
 0x11b   :  { %719 = vmatmul.mubr.bf16.vlgmr.msra.gmra.mrb[4].mxu1 %v172_v50 }
 0x11c   :  { %750 = vmatprep.mubr.msk.bf16.mxu1 %vm807_vm0, %v806_v1  ;;  %747 = vmatpush3.bf16.msra.mxu1 %v774_v5 }
 0x11d   :  { %748 = vmatprep.subr.bf16.mxu1 %v806_v1 }
 0x120   :  { %749 = vmatpush3.bf16.msra.mxu1 %v775_v6 }
 0x1ee   :  { %v320_v57 = vpop.f32.mrb[4].mxu1 }
 0x1ef   :  { %v321_v59 = vadd.f32 %v320_v57, %v232_v51  ;;  %v720_v60 = vpop.f32.mrb[5].mxu1 }
 0x1f0   :  { %v323_v61 = vpop.f32.mrb[6].mxu1 }
 0x1f1   :  { %v333_v62 = vadd.f32 %v632_v58, %v321_v59  ;;  %v721_v63 = vpop.f32.mrb[7].mxu1 }
 0x1f3   :  { %v334_v0 = vmax.f32 %v333_v62, 0.0 }
 0x1f5   :  { %v335_v3 = vpack.c.bf16 %v334_v0, %v334_v0 }
 0x1f7   :  { %727 = vmatmul.mubr.msk.bf16.vlgmr.msra.gmra.mrb[4].mxu0 %vm357_vm4, %v335_v3  ;;  %414 = vrot.lane.b32.xlu0 %v335_v3, %s808_s13 }
 0x1f8   :  { %731 = vmatpush3.bf16.msra.mxu0 %v772_v2  ;;  %734 = vmatprep.mubr.msk.bf16.mxu0 %vm807_vm0, %v806_v1 }
 0x1f9   :  { %732 = vmatprep.subr.bf16.mxu0 %v806_v1 }
 0x1fc   :  { %733 = vmatpush3.bf16.msra.mxu0 %v773_v4 }
 0x1fd   :  { %738 = vmatprep.subr.bf16.mxu0 %v806_v1 }
 0x269   :  { %v415_v8 = vpop.permute.xlu0 %414 }
 0x26a   :  { %735 = vmatmul.mubr.msk.bf16.vlgmr.msra.gmra.mrb[8].mxu0 %vm357_vm4, %v415_v8 }
 0x26b   :  { %739 = vmatpush3.bf16.msra.mxu0 %v776_v7  ;;  %742 = vmatprep.mubr.msk.bf16.mxu0 %vm807_vm0, %v806_v1 }
 0x26c   :  { %740 = vmatprep.subr.bf16.mxu0 %v806_v1  ;;  %v641_v1 = vld [vmem:[%s1019_s8 + $0x1] ss:$0 sm:$0xff]  ;;  %s607_s8 = sshll.u32 %s809_s26, 4  ;;  %s608_s8 = int_to_ptr.vmem [resolvable:$true] %s607_s8 }
 0x26d   :  { %s782_s27 = scalar_lea.vmem %s608_s8, 128  ;;  %p787_p1 = scmp.lt.s32.totalorder %s608_s8, %s608_s8 }
 0x26e   :  { %p783_p0 = scmp.ne.s32.totalorder %s608_s8, %s782_s27  ;;  %p788_p2 = scmp.lt.s32.totalorder %s782_s27, %s782_s27 }
 0x26f   :  { %741 = vmatpush3.bf16.msra.mxu0 %v777_v9 }
 0x270   :  { %p789_p3 = por %p788_p2, %p787_p1 }
 0x272   :  { %p790_p4 = pnand %p789_p3, %p783_p0 }
 0x2ca   :  { %v395_v11 = vpop.f32.mrb[4].mxu0 }
 0x2cb   :  { %v396_v12 = vadd.f32 %v633_v10, %v395_v11  ;;  %v728_v13 = vpop.f32.mrb[5].mxu0 }
 0x2cc   :  { %v398_v14 = vpop.f32.mrb[6].mxu0 }
 0x2cd   :  { %v401_v15 = vmax.f32 %v396_v12, 0.0  ;;  %v729_v16 = vpop.f32.mrb[7].mxu0 }
 0x2cf   :  { %v402_v17 = vpack.c.bf16 %v401_v15, %v401_v15 }
 0x2d1   :  { %751 = vmatmul.mubr.msk.bf16.vlgmr.msra.gmra.mrb[8].mxu1 %vm357_vm4, %v402_v17 }
 0x33d   :  { %v465_v18 = vpop.f32.mrb[8].mxu0 }
 0x33e   :  { %v466_v19 = vadd.f32 %v641_v1, %v465_v18  ;;  %v736_v20 = vpop.f32.mrb[9].mxu0 }
 0x33f   :  { %v468_v21 = vpop.f32.mrb[10].mxu0 }
 0x340   :  { %v471_v22 = vmax.f32 %v466_v19, 0.0  ;;  %v737_v23 = vpop.f32.mrb[11].mxu0 }
 0x342   :  { %v472_v24 = vpack.c.bf16 %v471_v22, %v471_v22 }
 0x344   :  { %743 = vmatmul.mubr.msk.bf16.vlgmr.msra.gmra.mrb[12].mxu0 %vm357_vm4, %v472_v24 }
 0x3a4   :  { %v586_v25 = vpop.f32.mrb[8].mxu1 }
 0x3a5   :  { %v752_v26 = vpop.f32.mrb[9].mxu1 }
 0x3a6   :  { %v589_v27 = vpop.f32.mrb[10].mxu1 }
 0x3a7   :  { %v753_v28 = vpop.f32.mrb[11].mxu1 }
 0x417   :  { %v531_v29 = vpop.f32.mrb[12].mxu0 }
 0x418   :  { %v587_v31 = vadd.f32 %v586_v25, %v531_v29  ;;  %v744_v32 = vpop.f32.mrb[13].mxu0 }
 0x419   :  { %v534_v33 = vpop.f32.mrb[14].mxu0 }
 0x41a   :  { %v745_v34 = vpop.f32.mrb[15].mxu0  ;;  %v599_v35 = vadd.f32 %v655_v30, %v587_v31 }
 0x41c   :  { %600 = vst [vmem:[#allocation3] sm:$0xff] %v599_v35 }
 0x41d   :  { %793 = shalt.err (!%p790_p4)
}
 0x41e   :  { %s794_s10 = scalar_lea.hbm %s1022_s11, 128 }
 0x41f   :  { %p795_p5 = scmp.ne.s32.totalorder %s1022_s11, %s794_s10  ;;  %p798_p6 = scmp.lt.u32.totalorder %s794_s10, %s1022_s11 }
 0x421   :  { %p800_p7 = pnand %p798_p6, %p795_p5 }
 0x423   :  { %803 = shalt.err (!%p800_p7)
}
 0x424   :  { %610 = dma.vmem_to_hbm [thread:$0]  %s608_s8, 128, %s1022_s11, [#allocation4]  }
 0x425   :  { %804 = dma.done.wait [#allocation4], 128  }
 0x426   :  { %805 = vsyncadd [#allocation4], 4294967168 }
 0x427   :  { %614 = vsyncpa [#allocation4], 1 }

// kernel: tpu_custom_call.1
= control target key start
LH: loop header
LB: loop body
LE: loop exit
PB: predicated region body
PF: predicated region fallthrough
CT: control target
= control target key end

     0   :  { %v806_v1 = vmov 0.0   ;;  %vm807_vm0 = vmmov 0   ;;  %vm79_vm1 = vcmask 523264   ;;  %s1011_s0 = inlined_call_operand.vmem [shape: bf16[8,64], index: 0, kind: input, shape index: {}]   ;;  %s1012_s1 = inlined_call_operand.vmem [shape: bf16[8,4], index: 1, kind: input, shape index: {}]   ;;  %s1013_s2 = inlined_call_operand.vmem [shape: bf16[64,128], index: 2, kind: input, shape index: {}]   ;;  %s1014_s3 = inlined_call_operand.vmem [shape: f32[3,128], index: 3, kind: input, shape index: {}]   ;;  %s1015_s4 = inlined_call_operand.vmem [shape: bf16[128,64], index: 4, kind: input, shape index: {}]   ;;  %s1016_s5 = inlined_call_operand.vmem [shape: bf16[4,64], index: 5, kind: input, shape index: {}]   ;;  %s1017_s6 = inlined_call_operand.vmem [shape: f32[1,64], index: 6, kind: input, shape index: {}]   ;;  %s1018_s7 = inlined_call_operand.vmem [shape: bf16[2,32,32], index: 7, kind: input, shape index: {}]   ;;  %s1019_s8 = inlined_call_operand.vmem [shape: f32[2,32], index: 8, kind: input, shape index: {}]   ;;  %s1020_s9 = inlined_call_operand.vmem [shape: bf16[2,32,128], index: 9, kind: input, shape index: {}]   ;;  %s1021_s10 = inlined_call_operand.vmem [shape: f32[1,128], index: 10, kind: input, shape index: {}]   ;;  %s1022_s11 = inlined_call_operand.hbm [shape: f32[8,128], index: 11, kind: output, shape index: {}]  }
   0x1   :  { %v758_v0 = vld [vmem:[%s1013_s2] sm:$0xff]   ;;  %684 = vmatprep.subr.bf16.mxu0 %v806_v1  ;;  %696 = vmatprep.subr.bf16.mxu1 %v806_v1  ;;  %v759_v2 = vld [vmem:[%s1013_s2 + $0x8] sm:$0xff]   ;;  %v760_v3 = vld [vmem:[%s1013_s2 + $0x10] sm:$0xff]  }
   0x2   :  { %685 = vmatpush3.bf16.msra.mxu0 %v758_v0  ;;  %692 = vmatprep.mubr.msk.bf16.mxu0 %vm807_vm0, %v806_v1  ;;  %v761_v4 = vld [vmem:[%s1013_s2 + $0x18] sm:$0xff]   ;;  %v45_v5 = vld [vmem:[%s1011_s0] sm:$0xf] }
   0x3   :  { %686 = vmatprep.subr.bf16.mxu0 %v806_v1  ;;  %698 = vmatprep.mubr.msk.bf16.mxu1 %vm807_vm0, %v806_v1 }
   0x6   :  { %687 = vmatpush3.bf16.msra.mxu0 %v759_v2 }
   0x7   :  { %688 = vmatprep.subr.bf16.mxu0 %v806_v1 }
   0xa   :  { %689 = vmatpush3.bf16.msra.mxu0 %v760_v3 }
   0xb   :  { %690 = vmatprep.subr.bf16.mxu0 %v806_v1 }
   0xe   :  { %691 = vmatpush3.bf16.msra.mxu0 %v761_v4 }
   0xf   :  { %722 = vmatprep.subr.bf16.mxu0 %v806_v1 }
  0x10   :  { %16 = vsyncpa [#allocation4], 0  ;;  %v189_v6 = vld [vmem:[%s1016_s5] sm:$0x3]  ;;  %vm194_vm2 = vcmask 1041408   ;;  %vm190_vm3 = vcmask 31744  }
  0x11   :  { %693 = vmatmul.mubr.msk.bf16.vlgmr.msra.gmra.mrb[0].mxu0 %vm79_vm1, %v45_v5  ;;  %v196_v7 = vsel %vm194_vm2, %v189_v6, 0  ;;  %v171_v8 = vld [vmem:[%s1012_s1] sm:$0xf]  ;;  %v763_v10 = vld [vmem:[%s1015_s4 + $0x8] sm:$0xff]   ;;  %v764_v11 = vld [vmem:[%s1015_s4 + $0x10] sm:$0xff]   ;;  %vm357_vm4 = vcmask 261120  }
  0x12   :  { %726 = vmatprep.mubr.msk.bf16.mxu0 %vm807_vm0, %v806_v1  ;;  %697 = vmatpush3.bf16.msra.mxu1 %v196_v7  ;;  %v762_v9 = vld [vmem:[%s1015_s4] sm:$0xff]   ;;  %v765_v12 = vld [vmem:[%s1015_s4 + $0x18] sm:$0xff]   ;;  %v767_v14 = vld [vmem:[%s1015_s4 + $0x28] sm:$0xff]   ;;  %s808_s13 = smov 96   ;;  %s809_s26 = smov [#allocation3]  }
  0x13   :  { %702 = vmatprep.subr.bf16.mxu1 %v806_v1  ;;  %v766_v13 = vld [vmem:[%s1015_s4 + $0x20] sm:$0xff]   ;;  %v768_v15 = vld [vmem:[%s1015_s4 + $0x30] sm:$0xff]   ;;  %v769_v16 = vld [vmem:[%s1015_s4 + $0x38] sm:$0xff]  }
  0x14   :  { %v620_v17 = vld [vmem:[%s1014_s3] ss:$0 sm:$0xff]  ;;  %v621_v44 = vld [vmem:[%s1014_s3 + $0x1] ss:$0 sm:$0xff]  ;;  %v622_v46 = vld [vmem:[%s1014_s3 + $0x2] ss:$0 sm:$0xff] }
  0x15   :  { %699 = vmatmul.mubr.msk.bf16.vlgmr.msra.gmra.mrb[0].mxu1 %vm190_vm3, %v171_v8  ;;  %v770_v55 = vld [vmem:[%s1018_s7] sm:$0xff]   ;;  %v771_v56 = vld [vmem:[%s1018_s7 + $0x8] sm:$0xff]   ;;  %v772_v2 = vld [vmem:[%s1018_s7 + $0x10] sm:$0xff]  }
  0x16   :  { %718 = vmatprep.mubr.msk.bf16.mxu1 %vm807_vm0, %v806_v1  ;;  %703 = vmatpush3.bf16.msra.mxu1 %v762_v9  ;;  %v632_v58 = vld [vmem:[%s1017_s6] ss:$0 sm:$0xff]  ;;  %v773_v4 = vld [vmem:[%s1018_s7 + $0x18] sm:$0xff]   ;;  %v775_v6 = vld [vmem:[%s1020_s9 + $0x8] sm:$0xff]  }
  0x17   :  { %704 = vmatprep.subr.bf16.mxu1 %v806_v1  ;;  %723 = vmatpush3.bf16.msra.mxu0 %v770_v55  ;;  %v774_v5 = vld [vmem:[%s1020_s9] sm:$0xff]   ;;  %v776_v7 = vld [vmem:[%s1020_s9 + $0x10] sm:$0xff]   ;;  %v777_v9 = vld [vmem:[%s1020_s9 + $0x18] sm:$0xff]  }
  0x18   :  { %724 = vmatprep.subr.bf16.mxu0 %v806_v1 }
  0x1a   :  { %705 = vmatpush3.bf16.msra.mxu1 %v763_v10  ;;  %v633_v10 = vld [vmem:[%s1019_s8] ss:$0 sm:$0xff] }
  0x1b   :  { %706 = vmatprep.subr.bf16.mxu1 %v806_v1  ;;  %725 = vmatpush3.bf16.msra.mxu0 %v771_v56 }
  0x1c   :  { %730 = vmatprep.subr.bf16.mxu0 %v806_v1 }
  0x1e   :  { %707 = vmatpush3.bf16.msra.mxu1 %v764_v11 }
  0x1f   :  { %708 = vmatprep.subr.bf16.mxu1 %v806_v1 }
  0x22   :  { %709 = vmatpush3.bf16.msra.mxu1 %v765_v12 }
  0x23   :  { %710 = vmatprep.subr.bf16.mxu1 %v806_v1 }
  0x26   :  { %711 = vmatpush3.bf16.msra.mxu1 %v766_v13 }
  0x27   :  { %712 = vmatprep.subr.bf16.mxu1 %v806_v1 }
  0x2a   :  { %713 = vmatpush3.bf16.msra.mxu1 %v767_v14 }
  0x2b   :  { %714 = vmatprep.subr.bf16.mxu1 %v806_v1 }
  0x2e   :  { %715 = vmatpush3.bf16.msra.mxu1 %v768_v15 }
  0x2f   :  { %716 = vmatprep.subr.bf16.mxu1 %v806_v1 }
  0x32   :  { %717 = vmatpush3.bf16.msra.mxu1 %v769_v16 }
  0x33   :  { %746 = vmatprep.subr.bf16.mxu1 %v806_v1 }
  0xe4   :  { %v117_v18 = vpop.f32.mrb[0].mxu0 }
  0xe5   :  { %v136_v19 = vadd.f32 %v620_v17, %v117_v18  ;;  %v694_v20 = vpop.f32.mrb[1].mxu0 }
  0xe6   :  { %v120_v21 = vpop.f32.mrb[2].mxu0 }
  0xe7   :  { %v137_v22 = vrot.slane %v136_v19, 4  ;;  %v145_v23 = vmul.f32 %v136_v19, %v136_v19  ;;  %v695_v24 = vpop.f32.mrb[3].mxu0 }
  0xe8   :  { %v232_v51 = vpop.f32.mrb[0].mxu1 }
  0xe9   :  { %v138_v25 = vadd.f32 %v137_v22, %v136_v19  ;;  %v146_v26 = vrot.slane %v145_v23, 4  ;;  %v700_v52 = vpop.f32.mrb[1].mxu1 }
  0xea   :  { %v235_v53 = vpop.f32.mrb[2].mxu1 }
  0xeb   :  { %v139_v27 = vrot.slane %v138_v25, 2  ;;  %v147_v28 = vadd.f32 %v146_v26, %v145_v23  ;;  %v701_v54 = vpop.f32.mrb[3].mxu1 }
  0xed   :  { %v140_v29 = vadd.f32 %v139_v27, %v138_v25  ;;  %v148_v30 = vrot.slane %v147_v28, 2 }
  0xef   :  { %v141_v31 = vrot.slane %v140_v29, 1  ;;  %v149_v32 = vadd.f32 %v148_v30, %v147_v28  ;;  %v655_v30 = vld [vmem:[%s1021_s10] ss:$0 sm:$0xff] }
  0xf1   :  { %v142_v33 = vadd.f32 %v141_v31, %v140_v29  ;;  %v150_v34 = vrot.slane %v149_v32, 1 }
  0xf3   :  { %v144_v35 = vmul.f32 0.125, %v142_v33  ;;  %v151_v36 = vadd.f32 %v150_v34, %v149_v32 }
  0xf5   :  { %v152_v37 = vmul.f32 0.125, %v151_v36  ;;  %v153_v38 = vmul.f32 %v144_v35, %v144_v35  ;;  %v156_v42 = vsub.f32 %v136_v19, %v144_v35 }
  0xf7   :  { %v154_v39 = vsub.f32 %v152_v37, %v153_v38 }
  0xf9   :  { %v155_v40 = vmax.f32 %v154_v39, 0.0 }
  0xfb   :  { %v157_v41 = vadd.f32 1e-05, %v155_v40 }
  0xfd   :  { %778 = vrsqrt.f32 %v157_v41 }
 0x107   :  { %v779_v43 = vpop.eup %778 }
 0x108   :  { %v159_v45 = vmul.f32 %v779_v43, %v156_v42 }
 0x10a   :  { %v164_v47 = vmul.f32 %v621_v44, %v159_v45 }
 0x10c   :  { %v169_v48 = vadd.f32 %v622_v46, %v164_v47 }
 0x10e   :  { %780 = vtanh.f32 %v169_v48 }
 0x118   :  { %v781_v49 = vpop.eup %780 }
 0x119   :  { %v172_v50 = vpack.c.bf16 %v781_v49, %v781_v49 }
 0x11b   :  { %719 = vmatmul.mubr.bf16.vlgmr.msra.gmra.mrb[4].mxu1 %v172_v50 }
 0x11c   :  { %750 = vmatprep.mubr.msk.bf16.mxu1 %vm807_vm0, %v806_v1  ;;  %747 = vmatpush3.bf16.msra.mxu1 %v774_v5 }
 0x11d   :  { %748 = vmatprep.subr.bf16.mxu1 %v806_v1 }
 0x120   :  { %749 = vmatpush3.bf16.msra.mxu1 %v775_v6 }
 0x1ee   :  { %v320_v57 = vpop.f32.mrb[4].mxu1 }
 0x1ef   :  { %v321_v59 = vadd.f32 %v320_v57, %v232_v51  ;;  %v720_v60 = vpop.f32.mrb[5].mxu1 }
 0x1f0   :  { %v323_v61 = vpop.f32.mrb[6].mxu1 }
 0x1f1   :  { %v333_v62 = vadd.f32 %v632_v58, %v321_v59  ;;  %v721_v63 = vpop.f32.mrb[7].mxu1 }
 0x1f3   :  { %v334_v0 = vmax.f32 %v333_v62, 0.0 }
 0x1f5   :  { %v335_v3 = vpack.c.bf16 %v334_v0, %v334_v0 }
 0x1f7   :  { %727 = vmatmul.mubr.msk.bf16.vlgmr.msra.gmra.mrb[4].mxu0 %vm357_vm4, %v335_v3  ;;  %414 = vrot.lane.b32.xlu0 %v335_v3, %s808_s13 }
 0x1f8   :  { %731 = vmatpush3.bf16.msra.mxu0 %v772_v2  ;;  %734 = vmatprep.mubr.msk.bf16.mxu0 %vm807_vm0, %v806_v1 }
 0x1f9   :  { %732 = vmatprep.subr.bf16.mxu0 %v806_v1 }
 0x1fc   :  { %733 = vmatpush3.bf16.msra.mxu0 %v773_v4 }
 0x1fd   :  { %738 = vmatprep.subr.bf16.mxu0 %v806_v1 }
 0x269   :  { %v415_v8 = vpop.permute.xlu0 %414 }
 0x26a   :  { %735 = vmatmul.mubr.msk.bf16.vlgmr.msra.gmra.mrb[8].mxu0 %vm357_vm4, %v415_v8 }
 0x26b   :  { %739 = vmatpush3.bf16.msra.mxu0 %v776_v7  ;;  %742 = vmatprep.mubr.msk.bf16.mxu0 %vm807_vm0, %v806_v1 }
 0x26c   :  { %740 = vmatprep.subr.bf16.mxu0 %v806_v1  ;;  %v641_v1 = vld [vmem:[%s1019_s8 + $0x1] ss:$0 sm:$0xff]  ;;  %s607_s8 = sshll.u32 %s809_s26, 4  ;;  %s608_s8 = int_to_ptr.vmem [resolvable:$true] %s607_s8 }
 0x26d   :  { %s782_s27 = scalar_lea.vmem %s608_s8, 128  ;;  %p787_p1 = scmp.lt.s32.totalorder %s608_s8, %s608_s8 }
 0x26e   :  { %p783_p0 = scmp.ne.s32.totalorder %s608_s8, %s782_s27  ;;  %p788_p2 = scmp.lt.s32.totalorder %s782_s27, %s782_s27 }
 0x26f   :  { %741 = vmatpush3.bf16.msra.mxu0 %v777_v9 }
 0x270   :  { %p789_p3 = por %p788_p2, %p787_p1 }
 0x272   :  { %p790_p4 = pnand %p789_p3, %p783_p0 }
 0x2ca   :  { %v395_v11 = vpop.f32.mrb[4].mxu0 }
 0x2cb   :  { %v396_v12 = vadd.f32 %v633_v10, %v395_v11  ;;  %v728_v13 = vpop.f32.mrb[5].mxu0 }
 0x2cc   :  { %v398_v14 = vpop.f32.mrb[6].mxu0 }
 0x2cd   :  { %v401_v15 = vmax.f32 %v396_v12, 0.0  ;;  %v729_v16 = vpop.f32.mrb[7].mxu0 }
 0x2cf   :  { %v402_v17 = vpack.c.bf16 %v401_v15, %v401_v15 }
 0x2d1   :  { %751 = vmatmul.mubr.msk.bf16.vlgmr.msra.gmra.mrb[8].mxu1 %vm357_vm4, %v402_v17 }
 0x33d   :  { %v465_v18 = vpop.f32.mrb[8].mxu0 }
 0x33e   :  { %v466_v19 = vadd.f32 %v641_v1, %v465_v18  ;;  %v736_v20 = vpop.f32.mrb[9].mxu0 }
 0x33f   :  { %v468_v21 = vpop.f32.mrb[10].mxu0 }
 0x340   :  { %v471_v22 = vmax.f32 %v466_v19, 0.0  ;;  %v737_v23 = vpop.f32.mrb[11].mxu0 }
 0x342   :  { %v472_v24 = vpack.c.bf16 %v471_v22, %v471_v22 }
 0x344   :  { %743 = vmatmul.mubr.msk.bf16.vlgmr.msra.gmra.mrb[12].mxu0 %vm357_vm4, %v472_v24 }
 0x3a4   :  { %v586_v25 = vpop.f32.mrb[8].mxu1 }
 0x3a5   :  { %v752_v26 = vpop.f32.mrb[9].mxu1 }
 0x3a6   :  { %v589_v27 = vpop.f32.mrb[10].mxu1 }
 0x3a7   :  { %v753_v28 = vpop.f32.mrb[11].mxu1 }
 0x417   :  { %v531_v29 = vpop.f32.mrb[12].mxu0 }
 0x418   :  { %v587_v31 = vadd.f32 %v586_v25, %v531_v29  ;;  %v744_v32 = vpop.f32.mrb[13].mxu0 }
 0x419   :  { %v534_v33 = vpop.f32.mrb[14].mxu0 }
 0x41a   :  { %v745_v34 = vpop.f32.mrb[15].mxu0  ;;  %v599_v35 = vadd.f32 %v655_v30, %v587_v31 }
 0x41c   :  { %600 = vst [vmem:[#allocation3] sm:$0xff] %v599_v35 }
 0x41d   :  { %793 = shalt.err (!%p790_p4)
}
 0x41e   :  { %s794_s10 = scalar_lea.hbm %s1022_s11, 128 }
 0x41f   :  { %p795_p5 = scmp.ne.s32.totalorder %s1022_s11, %s794_s10  ;;  %p798_p6 = scmp.lt.u32.totalorder %s794_s10, %s1022_s11 }
 0x421   :  { %p800_p7 = pnand %p798_p6, %p795_p5 }
 0x423   :  { %803 = shalt.err (!%p800_p7)
}
 0x424   :  { %610 = dma.vmem_to_hbm [thread:$0]  %s608_s8, 128, %s1022_s11, [#allocation4]  }
 0x425   :  { %804 = dma.done.wait [#allocation4], 128  }
 0x426   :  { %805 = vsyncadd [#allocation4], 4294967168 }
 0x427   :  { %614 = vsyncpa [#allocation4], 1 }

</bundles_post_ra>
